<compile_context>
chip_gen: v7x
topology: tpu7x:2x2x1
jax: 0.10.0
libtpu: 0.0.40
codegen_flags: <defaults>
</compile_context>

<pallas_src>
import jax
import jax.numpy as jnp
from jax.experimental import pallas as pl
from jax.experimental.pallas import tpu as pltpu

K_RAW = 28 * 28   # 784
K_PAD = 896       # 7 * 128 (lane-aligned contraction dim)
H1 = 128
H2_RAW = 32
H2_PAD = 128
OUT_RAW = 10
OUT_PAD = 128


def _round_up(n, m):
    return ((n + m - 1) // m) * m


def mlp_kernel(x_ref, w1_ref, b1_ref, w2_ref, b2_ref, w3_ref, b3_ref, o_ref):
    # Fully fused 3-layer MLP. Matmul operands are bf16 (MXU fast path),
    # accumulation and elementwise bias/ReLU are f32.
    x = x_ref[...]                                                   # (bt, 896) bf16
    h1 = jnp.dot(x, w1_ref[...], preferred_element_type=jnp.float32) + b1_ref[...]
    h1 = jnp.maximum(h1, 0.0).astype(jnp.bfloat16)                   # (bt, 128)
    h2 = jnp.dot(h1, w2_ref[...], preferred_element_type=jnp.float32) + b2_ref[...]
    h2 = jnp.maximum(h2, 0.0).astype(jnp.bfloat16)                   # (bt, 128) (cols 32.. are 0)
    h3 = jnp.dot(h2, w3_ref[...], preferred_element_type=jnp.float32) + b3_ref[...]
    o_ref[...] = h3.astype(o_ref.dtype)                              # (bt, 128) (cols 10.. are 0)


def prepare_params(params):
    """One-time prep (keep OUT of the per-step path): transpose torch-style
    (out, in) weights to (in, out), zero-pad every narrow dim to a lane
    multiple, and cast matmul operands to bf16. Biases stay f32."""
    w1, b1, w2, b2, w3, b3 = params
    w1t = jnp.zeros((K_PAD, H1), jnp.float32).at[:K_RAW, :].set(w1.T)
    w2t = jnp.zeros((H1, H2_PAD), jnp.float32).at[:, :H2_RAW].set(w2.T)
    w3t = jnp.zeros((H2_PAD, OUT_PAD), jnp.float32).at[:H2_RAW, :OUT_RAW].set(w3.T)
    b1p = b1.reshape(1, H1).astype(jnp.float32)
    b2p = jnp.zeros((1, H2_PAD), jnp.float32).at[:, :H2_RAW].set(b2)
    b3p = jnp.zeros((1, OUT_PAD), jnp.float32).at[:, :OUT_RAW].set(b3)
    return (w1t.astype(jnp.bfloat16), b1p,
            w2t.astype(jnp.bfloat16), b2p,
            w3t.astype(jnp.bfloat16), b3p)


def mlp_forward(x_nchw, prepared, *, batch_tile=None):
    """x_nchw: (B, 1, 28, 28) float32 -> logits (B, 10) float32."""
    B = x_nchw.shape[0]
    x = x_nchw.reshape(B, K_RAW)  # same semantics as x.view(-1, 784)

    if batch_tile is None:
        # Large batch tile for MXU/HBM efficiency; 1024 rows of bf16 x is
        # ~1.8 MB per buffer, well inside even v7x's 64 MiB VMEM, and keeps
        # grid >= 2 (megacore sharding) once B > 1024.
        batch_tile = min(1024, _round_up(B, 8))
    B_pad = _round_up(B, batch_tile)

    # Zero-pad batch to the tile and K to the lane multiple; cast x to bf16.
    xp = jnp.zeros((B_pad, K_PAD), jnp.bfloat16)
    xp = xp.at[:B, :K_RAW].set(x.astype(jnp.bfloat16))

    w1t, b1p, w2t, b2p, w3t, b3p = prepared
    grid = (B_pad // batch_tile,)

    out = pl.pallas_call(
        mlp_kernel,
        out_shape=jax.ShapeDtypeStruct((B_pad, OUT_PAD), jnp.float32),
        grid_spec=pltpu.PrefetchScalarGridSpec(
            num_scalar_prefetch=0,
            grid=grid,
            in_specs=[
                pl.BlockSpec((batch_tile, K_PAD), lambda i: (i, 0)),  # x tile (streamed)
                pl.BlockSpec((K_PAD, H1), lambda i: (0, 0)),          # W1^T (VMEM-resident)
                pl.BlockSpec((1, H1), lambda i: (0, 0)),              # b1
                pl.BlockSpec((H1, H2_PAD), lambda i: (0, 0)),         # W2^T (padded)
                pl.BlockSpec((1, H2_PAD), lambda i: (0, 0)),          # b2 (padded)
                pl.BlockSpec((H2_PAD, OUT_PAD), lambda i: (0, 0)),    # W3^T (padded)
                pl.BlockSpec((1, OUT_PAD), lambda i: (0, 0)),         # b3 (padded)
            ],
            out_specs=pl.BlockSpec((batch_tile, OUT_PAD), lambda i: (i, 0)),
        ),
        compiler_params=pltpu.CompilerParams(
            dimension_semantics=("parallel",),
        ),
    )(xp, w1t, b1p, w2t, b2p, w3t, b3p)

    return out[:B, :OUT_RAW]


def init_params(key):
    """Deterministic synthetic params with torch nn.Linear shapes: W (out, in), b (out,)."""
    ks = jax.random.split(key, 6)

    def lin(kw, kb, fan_in, fan_out):
        bound = 1.0 / jnp.sqrt(fan_in)
        w = jax.random.uniform(kw, (fan_out, fan_in), jnp.float32, -bound, bound)
        b = jax.random.uniform(kb, (fan_out,), jnp.float32, -bound, bound)
        return w, b

    w1, b1 = lin(ks[0], ks[1], K_RAW, H1)
    w2, b2 = lin(ks[2], ks[3], H1, H2_RAW)
    w3, b3 = lin(ks[4], ks[5], H2_RAW, OUT_RAW)
    return (w1, b1, w2, b2, w3, b3)


def reference_forward(x_nchw, params):
    w1, b1, w2, b2, w3, b3 = params
    x = x_nchw.reshape(x_nchw.shape[0], K_RAW)
    h1 = jnp.maximum(x @ w1.T + b1, 0.0)
    h2 = jnp.maximum(h1 @ w2.T + b2, 0.0)
    return h2 @ w3.T + b3


if __name__ == "__main__":
    key = jax.random.PRNGKey(0)
    k_x, k_p = jax.random.split(key)

    B = 16
    x = jax.random.normal(k_x, (B, 1, 28, 28), jnp.float32)  # MNIST-like NCHW
    params = init_params(k_p)
    prepared = prepare_params(params)  # one-time weight prep (transpose/pad/bf16)

    out = mlp_forward(x, prepared)
    out = jax.block_until_ready(out)

    ref = reference_forward(x, params)  # f32 reference
    assert out.shape == (B, OUT_RAW)
    # bf16 matmul operands + f32 accumulation: relaxed tolerance vs f32 reference.
    assert jnp.allclose(out, ref, atol=5e-2, rtol=5e-2), (
        "mismatch vs JAX reference; max abs diff = %s" % float(jnp.max(jnp.abs(out - ref))))

    print("KERNEL_OK")
</pallas_src>

<mosaic_0001>
module attributes {stable_mosaic.version = 11 : i64} {
  func.func @mlp_kernel(%arg0: i32, %arg1: memref<16x896xbf16, #tpu.memory_space<vmem>>, %arg2: memref<896x128xbf16, #tpu.memory_space<vmem>>, %arg3: memref<1x128xf32, #tpu.memory_space<vmem>>, %arg4: memref<128x128xbf16, #tpu.memory_space<vmem>>, %arg5: memref<1x128xf32, #tpu.memory_space<vmem>>, %arg6: memref<128x128xbf16, #tpu.memory_space<vmem>>, %arg7: memref<1x128xf32, #tpu.memory_space<vmem>>, %arg8: memref<16x128xf32, #tpu.memory_space<vmem>>) attributes {dimension_semantics = [#tpu.dimension_semantics<parallel>], iteration_bounds = array<i64: 1>, scalar_prefetch = 0 : i64, scratch_operands = 0 : i64, tpu.core_type = #tpu.core_type<tc>, window_params = [{transform_indices = @transform_0, window_bounds = array<i64: 16, 896>}, {pipeline_mode = #tpu.pipeline_mode<synchronous>, transform_indices = @transform_1, window_bounds = array<i64: 896, 128>}, {pipeline_mode = #tpu.pipeline_mode<synchronous>, transform_indices = @transform_2, window_bounds = array<i64: 1, 128>}, {pipeline_mode = #tpu.pipeline_mode<synchronous>, transform_indices = @transform_3, window_bounds = array<i64: 128, 128>}, {pipeline_mode = #tpu.pipeline_mode<synchronous>, transform_indices = @transform_4, window_bounds = array<i64: 1, 128>}, {pipeline_mode = #tpu.pipeline_mode<synchronous>, transform_indices = @transform_5, window_bounds = array<i64: 128, 128>}, {pipeline_mode = #tpu.pipeline_mode<synchronous>, transform_indices = @transform_6, window_bounds = array<i64: 1, 128>}, {transform_indices = @transform_7, window_bounds = array<i64: 16, 128>}]} {
    %c0 = arith.constant 0 : index
    %c0_0 = arith.constant 0 : index
    %0 = vector.load %arg1[%c0, %c0_0] : memref<16x896xbf16, #tpu.memory_space<vmem>>, vector<16x896xbf16>
    %c0_1 = arith.constant 0 : index
    %c0_2 = arith.constant 0 : index
    %1 = vector.load %arg2[%c0_1, %c0_2] : memref<896x128xbf16, #tpu.memory_space<vmem>>, vector<896x128xbf16>
    %cst = arith.constant dense<0.000000e+00> : vector<16x128xf32>
    %2 = tpu.matmul %0, %1, %cst {dimension_numbers = #tpu.dot_dimension_numbers<[1], [0], [0], [1], [0, 0, 1, 1], [], []>} : vector<16x896xbf16>, vector<896x128xbf16>, vector<16x128xf32> -> vector<16x128xf32>
    %c0_3 = arith.constant 0 : index
    %c0_4 = arith.constant 0 : index
    %3 = vector.load %arg3[%c0_3, %c0_4] : memref<1x128xf32, #tpu.memory_space<vmem>>, vector<1x128xf32>
    %4 = vector.broadcast %3 : vector<1x128xf32> to vector<16x128xf32>
    %5 = arith.addf %2, %4 : vector<16x128xf32>
    %cst_5 = arith.constant 0.000000e+00 : f32
    %6 = vector.broadcast %cst_5 : f32 to vector<16x128xf32>
    %7 = arith.maximumf %5, %6 : vector<16x128xf32>
    %8 = arith.truncf %7 : vector<16x128xf32> to vector<16x128xbf16>
    %c0_6 = arith.constant 0 : index
    %c0_7 = arith.constant 0 : index
    %9 = vector.load %arg4[%c0_6, %c0_7] : memref<128x128xbf16, #tpu.memory_space<vmem>>, vector<128x128xbf16>
    %cst_8 = arith.constant dense<0.000000e+00> : vector<16x128xf32>
    %10 = tpu.matmul %8, %9, %cst_8 {dimension_numbers = #tpu.dot_dimension_numbers<[1], [0], [0], [1], [0, 0, 1, 1], [], []>} : vector<16x128xbf16>, vector<128x128xbf16>, vector<16x128xf32> -> vector<16x128xf32>
    %c0_9 = arith.constant 0 : index
    %c0_10 = arith.constant 0 : index
    %11 = vector.load %arg5[%c0_9, %c0_10] : memref<1x128xf32, #tpu.memory_space<vmem>>, vector<1x128xf32>
    %12 = vector.broadcast %11 : vector<1x128xf32> to vector<16x128xf32>
    %13 = arith.addf %10, %12 : vector<16x128xf32>
    %cst_11 = arith.constant 0.000000e+00 : f32
    %14 = vector.broadcast %cst_11 : f32 to vector<16x128xf32>
    %15 = arith.maximumf %13, %14 : vector<16x128xf32>
    %16 = arith.truncf %15 : vector<16x128xf32> to vector<16x128xbf16>
    %c0_12 = arith.constant 0 : index
    %c0_13 = arith.constant 0 : index
    %17 = vector.load %arg6[%c0_12, %c0_13] : memref<128x128xbf16, #tpu.memory_space<vmem>>, vector<128x128xbf16>
    %cst_14 = arith.constant dense<0.000000e+00> : vector<16x128xf32>
    %18 = tpu.matmul %16, %17, %cst_14 {dimension_numbers = #tpu.dot_dimension_numbers<[1], [0], [0], [1], [0, 0, 1, 1], [], []>} : vector<16x128xbf16>, vector<128x128xbf16>, vector<16x128xf32> -> vector<16x128xf32>
    %c0_15 = arith.constant 0 : index
    %c0_16 = arith.constant 0 : index
    %19 = vector.load %arg7[%c0_15, %c0_16] : memref<1x128xf32, #tpu.memory_space<vmem>>, vector<1x128xf32>
    %20 = vector.broadcast %19 : vector<1x128xf32> to vector<16x128xf32>
    %21 = arith.addf %18, %20 : vector<16x128xf32>
    %c0_17 = arith.constant 0 : index
    %c0_18 = arith.constant 0 : index
    %22 = vector.load %arg8[%c0_17, %c0_18] : memref<16x128xf32, #tpu.memory_space<vmem>>, vector<16x128xf32>
    tpu.vector_store %arg8[%c0_17, %c0_18], %21 {strides = array<i32>} : memref<16x128xf32, #tpu.memory_space<vmem>>, vector<16x128xf32>,
    return
  }
  func.func @transform_0(%arg0: i32) -> (i32, i32) {
    %c0_i32 = arith.constant 0 : i32
    %c0_i32_0 = arith.constant 0 : i32
    return %arg0, %c0_i32 : i32, i32
  }
  func.func @transform_1(%arg0: i32) -> (i32, i32) {
    %c0_i32 = arith.constant 0 : i32
    %c0_i32_0 = arith.constant 0 : i32
    %c0_i32_1 = arith.constant 0 : i32
    return %c0_i32, %c0_i32_0 : i32, i32
  }
  func.func @transform_2(%arg0: i32) -> (i32, i32) {
    %c0_i32 = arith.constant 0 : i32
    %c0_i32_0 = arith.constant 0 : i32
    %c0_i32_1 = arith.constant 0 : i32
    return %c0_i32, %c0_i32_0 : i32, i32
  }
  func.func @transform_3(%arg0: i32) -> (i32, i32) {
    %c0_i32 = arith.constant 0 : i32
    %c0_i32_0 = arith.constant 0 : i32
    %c0_i32_1 = arith.constant 0 : i32
    return %c0_i32, %c0_i32_0 : i32, i32
  }
  func.func @transform_4(%arg0: i32) -> (i32, i32) {
    %c0_i32 = arith.constant 0 : i32
    %c0_i32_0 = arith.constant 0 : i32
    %c0_i32_1 = arith.constant 0 : i32
    return %c0_i32, %c0_i32_0 : i32, i32
  }
  func.func @transform_5(%arg0: i32) -> (i32, i32) {
    %c0_i32 = arith.constant 0 : i32
    %c0_i32_0 = arith.constant 0 : i32
    %c0_i32_1 = arith.constant 0 : i32
    return %c0_i32, %c0_i32_0 : i32, i32
  }
  func.func @transform_6(%arg0: i32) -> (i32, i32) {
    %c0_i32 = arith.constant 0 : i32
    %c0_i32_0 = arith.constant 0 : i32
    %c0_i32_1 = arith.constant 0 : i32
    return %c0_i32, %c0_i32_0 : i32, i32
  }
  func.func @transform_7(%arg0: i32) -> (i32, i32) {
    %c0_i32 = arith.constant 0 : i32
    %c0_i32_0 = arith.constant 0 : i32
    return %arg0, %c0_i32 : i32, i32
  }
}

</mosaic_0001>

<bundles_post_ra>
// kernel: tpu_custom_call.1
= control target key start
LH: loop header
LB: loop body
LE: loop exit
PB: predicated region body
PF: predicated region fallthrough
CT: control target
= control target key end

     0   :  { %12 = vsyncpa [#allocation3], 0  ;;  %s1613_s0 = inlined_call_operand.hbm [shape: bf16[16,896], index: 0, kind: input, shape index: {}]   ;;  %s1614_s1 = inlined_call_operand.hbm [shape: bf16[896,128], index: 1, kind: input, shape index: {}]   ;;  %s1615_s2 = inlined_call_operand.vmem [shape: f32[1,128], index: 2, kind: input, shape index: {}]   ;;  %s1616_s3 = inlined_call_operand.hbm [shape: bf16[128,128], index: 3, kind: input, shape index: {}]   ;;  %s1617_s4 = inlined_call_operand.vmem [shape: f32[1,128], index: 4, kind: input, shape index: {}]   ;;  %s1618_s5 = inlined_call_operand.hbm [shape: bf16[128,128], index: 5, kind: input, shape index: {}]   ;;  %s1619_s6 = inlined_call_operand.vmem [shape: f32[1,128], index: 6, kind: input, shape index: {}]   ;;  %s1620_s7 = inlined_call_operand.hbm [shape: f32[16,128], index: 7, kind: output, shape index: {}]  }
   0x1   :  { %13 = vsyncpa [#allocation6], 0 }
   0x2   :  { %14 = vsyncpa [#allocation9], 0 }
   0x3   :  { %15 = vsyncpa [#allocation4], 0  ;;  %s1445_s24 = smov [#allocation5]   ;;  %s1327_s28 = scalar_lea.hbm %s1614_s1, 7168 }
   0x4   :  { %s33_s25 = sshll.u32 %s1445_s24, 4  ;;  %p1328_p0 = scmp.ne.s32.totalorder %s1614_s1, %s1327_s28  ;;  %s34_s25 = int_to_ptr.vmem [resolvable:$true] %s33_s25 }
   0x5   :  { %p1331_p1 = scmp.lt.u32.totalorder %s1327_s28, %s1614_s1 }
   0x7   :  { %p1333_p2 = pnand %p1331_p1, %p1328_p0 }
   0x9   :  { %1336 = shalt.err (!%p1333_p2)
}
   0xa   :  { %s1337_s10 = scalar_lea.vmem %s34_s25, 7168  ;;  %p1342_p4 = scmp.lt.s32.totalorder %s34_s25, %s34_s25 }
   0xb   :  { %p1338_p3 = scmp.ne.s32.totalorder %s34_s25, %s1337_s10  ;;  %p1343_p5 = scmp.lt.s32.totalorder %s1337_s10, %s1337_s10 }
   0xd   :  { %p1344_p6 = por %p1343_p5, %p1342_p4 }
   0xf   :  { %p1345_p7 = pnand %p1344_p6, %p1338_p3 }
  0x11   :  { %1348 = shalt.err (!%p1345_p7)
}
  0x12   :  { %s1446_s11 = smov 64   ;;  %s1447_s12 = smov 4  }
  0x13   :  { %39 = dma.hbm_to_vmem [thread:$0]  %s1614_s1, 7168, %s34_s25, [#allocation6], %s1446_s11, %s1446_s11, %s1447_s12  }
  0x14   :  { %s1448_s15 = smov [#allocation2]   ;;  %s1349_s19 = scalar_lea.hbm %s1613_s0, 896 }
  0x15   :  { %s21_s16 = sshll.u32 %s1448_s15, 4  ;;  %p1350_p8 = scmp.ne.s32.totalorder %s1613_s0, %s1349_s19  ;;  %s22_s16 = int_to_ptr.vmem [resolvable:$true] %s21_s16 }
  0x16   :  { %p1353_p9 = scmp.lt.u32.totalorder %s1349_s19, %s1613_s0 }
  0x18   :  { %p1355_p10 = pnand %p1353_p9, %p1350_p8 }
  0x1a   :  { %1358 = shalt.err (!%p1355_p10)
}
  0x1b   :  { %s1359_s24 = scalar_lea.vmem %s22_s16, 896  ;;  %p1364_p12 = scmp.lt.s32.totalorder %s22_s16, %s22_s16 }
  0x1c   :  { %p1360_p11 = scmp.ne.s32.totalorder %s22_s16, %s1359_s24  ;;  %p1365_p13 = scmp.lt.s32.totalorder %s1359_s24, %s1359_s24 }
  0x1e   :  { %p1366_p0 = por %p1365_p13, %p1364_p12 }
  0x20   :  { %p1367_p1 = pnand %p1366_p0, %p1360_p11 }
  0x22   :  { %1370 = shalt.err (!%p1367_p1)
}
  0x23   :  { %s1449_s1 = smov 448   ;;  %s1450_s25 = smov 28  }
  0x24   :  { %27 = dma.hbm_to_vmem [thread:$0]  %s1613_s0, 896, %s22_s16, [#allocation3], %s1449_s1, %s1449_s1, %s1450_s25  }
  0x25   :  { %s1451_s28 = smov [#allocation7]   ;;  %s1452_s30 = smov [#allocation8]  }
  0x26   :  { %s47_s29 = sshll.u32 %s1451_s28, 4  ;;  %s61_s8 = sshll.u32 %s1452_s30, 4  ;;  %s48_s29 = int_to_ptr.vmem [resolvable:$true] %s47_s29  ;;  %s1525_s8 = int_to_ptr.vmem [resolvable:$true] %s61_s8 }
  0x27   :  { %s1371_s13 = scalar_lea.hbm %s1616_s3, 1024 }
  0x28   :  { %p1372_p2 = scmp.ne.s32.totalorder %s1616_s3, %s1371_s13  ;;  %p1375_p3 = scmp.lt.u32.totalorder %s1371_s13, %s1616_s3 }
  0x2a   :  { %p1377_p4 = pnand %p1375_p3, %p1372_p2 }
  0x2c   :  { %1380 = shalt.err (!%p1377_p4)
}
  0x2d   :  { %s1381_s0 = scalar_lea.vmem %s48_s29, 1024  ;;  %p1386_p6 = scmp.lt.s32.totalorder %s48_s29, %s48_s29 }
  0x2e   :  { %p1382_p5 = scmp.ne.s32.totalorder %s48_s29, %s1381_s0  ;;  %p1387_p7 = scmp.lt.s32.totalorder %s1381_s0, %s1381_s0 }
  0x30   :  { %p1388_p8 = por %p1387_p7, %p1386_p6 }
  0x32   :  { %p1389_p9 = pnand %p1388_p8, %p1382_p5 }
  0x34   :  { %1392 = shalt.err (!%p1389_p9)
}
  0x35   :  { %53 = dma.hbm_to_vmem [thread:$0]  %s1616_s3, 1024, %s48_s29, [#allocation6], %s1446_s11, %s1446_s11, %s1447_s12  }
  0x36   :  { %s1393_s22 = scalar_lea.hbm %s1618_s5, 1024 }
  0x37   :  { %p1394_p10 = scmp.ne.s32.totalorder %s1618_s5, %s1393_s22  ;;  %p1397_p11 = scmp.lt.u32.totalorder %s1393_s22, %s1618_s5 }
  0x39   :  { %p1399_p12 = pnand %p1397_p11, %p1394_p10 }
  0x3b   :  { %1402 = shalt.err (!%p1399_p12)
}
  0x3c   :  { %s1403_s26 = scalar_lea.vmem %s1525_s8, 1024  ;;  %p1408_p0 = scmp.lt.s32.totalorder %s1525_s8, %s1525_s8 }
  0x3d   :  { %p1404_p13 = scmp.ne.s32.totalorder %s1525_s8, %s1403_s26  ;;  %p1409_p1 = scmp.lt.s32.totalorder %s1403_s26, %s1403_s26 }
  0x3f   :  { %p1410_p2 = por %p1409_p1, %p1408_p0 }
  0x41   :  { %p1411_p3 = pnand %p1410_p2, %p1404_p13 }
  0x43   :  { %1414 = shalt.err (!%p1411_p3)
}
  0x44   :  { %67 = dma.hbm_to_vmem [thread:$0]  %s1618_s5, 1024, %s1525_s8, [#allocation9], %s1446_s11, %s1446_s11, %s1447_s12  }
  0x45   :  { %1437 = dma.done.wait [#allocation3], 896  }
  0x46   :  { %1438 = vsyncadd [#allocation3], 4294966400 }
  0x47   :  { %1439 = dma.done.wait [#allocation6], 8192  }
  0x48   :  { %1440 = vsyncadd [#allocation6], 4294959104 }
  0x49   :  { %1441 = dma.done.wait [#allocation9], 1024  }
  0x4a   :  { %1442 = vsyncadd [#allocation9], 4294966272  ;;  %v1245_v0 = vld [vmem:[#allocation5 + $0x40] sm:$0xff]   ;;  %v1249_v4 = vld [vmem:[#allocation5 + $0x48] sm:$0xff]   ;;  %v1453_v38 = vmov 0.0   ;;  %vm1454_vm0 = vmmov 0  }
  0x4b   :  { %v1246_v1 = vld [vmem:[#allocation5] sm:$0xff]   ;;  %1079 = vmatprep.subr.bf16.mxu0 %v1245_v0  ;;  %v1250_v5 = vld [vmem:[#allocation5 + $0x8] sm:$0xff]   ;;  %v1253_v8 = vld [vmem:[#allocation5 + $0x50] sm:$0xff]   ;;  %s1455_s30 = smov [#allocation10]  }
  0x4c   :  { %v1247_v2 = vld [vmem:[#allocation5 + $0xc0] sm:$0xff]   ;;  %1080 = vmatpush3.bf16.msra.mxu0 %v1246_v1  ;;  %v1251_v6 = vld [vmem:[#allocation5 + $0xc8] sm:$0xff]   ;;  %v1254_v9 = vld [vmem:[#allocation5 + $0x10] sm:$0xff]   ;;  %s983_s8 = sshll.u32 %s1455_s30, 4  ;;  %s984_s8 = int_to_ptr.vmem [resolvable:$true] %s983_s8 }
  0x4d   :  { %v1248_v3 = vld [vmem:[#allocation5 + $0x80] sm:$0xff]   ;;  %1101 = vmatprep.subr.bf16.mxu1 %v1247_v2  ;;  %1081 = vmatprep.subr.bf16.mxu0 %v1249_v4  ;;  %v1252_v7 = vld [vmem:[#allocation5 + $0x88] sm:$0xff]   ;;  %v1255_v10 = vld [vmem:[#allocation5 + $0xd0] sm:$0xff]   ;;  %p1420_p5 = scmp.lt.s32.totalorder %s984_s8, %s984_s8 }
  0x4e   :  { %1102 = vmatpush3.bf16.msra.mxu1 %v1248_v3  ;;  %v1256_v11 = vld [vmem:[#allocation5 + $0x90] sm:$0xff]   ;;  %v1257_v12 = vld [vmem:[#allocation5 + $0x58] sm:$0xff]   ;;  %v1261_v16 = vld [vmem:[#allocation5 + $0x60] sm:$0xff]  }
  0x4f   :  { %1103 = vmatprep.subr.bf16.mxu1 %v1251_v6  ;;  %v1258_v13 = vld [vmem:[#allocation5 + $0x18] sm:$0xff]   ;;  %v1262_v17 = vld [vmem:[#allocation5 + $0x20] sm:$0xff]   ;;  %v1265_v20 = vld [vmem:[#allocation5 + $0x68] sm:$0xff]  }
  0x50   :  { %1082 = vmatpush3.bf16.msra.mxu0 %v1250_v5  ;;  %v1259_v14 = vld [vmem:[#allocation5 + $0xd8] sm:$0xff]   ;;  %v1263_v18 = vld [vmem:[#allocation5 + $0xe0] sm:$0xff]   ;;  %v1266_v21 = vld [vmem:[#allocation5 + $0x28] sm:$0xff]  }
  0x51   :  { %1083 = vmatprep.subr.bf16.mxu0 %v1253_v8  ;;  %v1260_v15 = vld [vmem:[#allocation5 + $0x98] sm:$0xff]   ;;  %v1264_v19 = vld [vmem:[#allocation5 + $0xa0] sm:$0xff]   ;;  %v1267_v22 = vld [vmem:[#allocation5 + $0xe8] sm:$0xff]  }
  0x52   :  { %1104 = vmatpush3.bf16.msra.mxu1 %v1252_v7  ;;  %v1268_v23 = vld [vmem:[#allocation5 + $0xa8] sm:$0xff]   ;;  %v1269_v24 = vld [vmem:[#allocation5 + $0x70] sm:$0xff]   ;;  %v1273_v28 = vld [vmem:[#allocation5 + $0x78] sm:$0xff]  }
  0x53   :  { %1105 = vmatprep.subr.bf16.mxu1 %v1255_v10  ;;  %v1270_v25 = vld [vmem:[#allocation5 + $0x30] sm:$0xff]   ;;  %v1274_v29 = vld [vmem:[#allocation5 + $0x38] sm:$0xff]   ;;  %v1276_v31 = vld [vmem:[#allocation2] ss:$28 sps:$4 sm:$0xff]  }
  0x54   :  { %1084 = vmatpush3.bf16.msra.mxu0 %v1254_v9  ;;  %v1271_v26 = vld [vmem:[#allocation5 + $0xf0] sm:$0xff]   ;;  %v1275_v30 = vld [vmem:[#allocation5 + $0xf8] sm:$0xff]   ;;  %v1278_v32 = vld [vmem:[#allocation2 + $0x4] ss:$28 sps:$4 sm:$0xff]  }
  0x55   :  { %1085 = vmatprep.subr.bf16.mxu0 %v1257_v12  ;;  %v1272_v27 = vld [vmem:[#allocation5 + $0xb0] sm:$0xff]   ;;  %v1279_v33 = vld [vmem:[#allocation5 + $0xb8] sm:$0xff]   ;;  %614 = vmatprep.mubr.bf16.mxu0 %v1278_v32  ;;  %v1280_v34 = vld [vmem:[#allocation5 + $0x140] sm:$0xff]  }
  0x56   :  { %1106 = vmatpush3.bf16.msra.mxu1 %v1256_v11  ;;  %v1281_v35 = vld [vmem:[#allocation2 + $0x8] ss:$28 sps:$4 sm:$0xff]   ;;  %v1284_v37 = vld [vmem:[#allocation5 + $0x100] sm:$0xff]   ;;  %v1292_v46 = vld [vmem:[#allocation5 + $0x158] sm:$0xff]  }
  0x57   :  { %1107 = vmatprep.subr.bf16.mxu1 %v1259_v14  ;;  %v1283_v36 = vld [vmem:[#allocation2 + $0xc] ss:$28 sps:$4 sm:$0xff]   ;;  %v1285_v39 = vld [vmem:[#allocation5 + $0x180] sm:$0xff]   ;;  %v1286_v40 = vld [vmem:[#allocation5 + $0x148] sm:$0xff]  }
  0x58   :  { %1086 = vmatpush3.bf16.msra.mxu0 %v1258_v13  ;;  %655 = vmatprep.mubr.bf16.mxu1 %v1283_v36  ;;  %v1287_v41 = vld [vmem:[#allocation5 + $0x108] sm:$0xff]   ;;  %v1289_v43 = vld [vmem:[#allocation5 + $0x150] sm:$0xff]   ;;  %v1293_v47 = vld [vmem:[#allocation5 + $0x118] sm:$0xff]  }
  0x59   :  { %1087 = vmatprep.subr.bf16.mxu0 %v1261_v16  ;;  %v1288_v42 = vld [vmem:[#allocation5 + $0x188] sm:$0xff]   ;;  %v1290_v44 = vld [vmem:[#allocation5 + $0x110] sm:$0xff]   ;;  %v1294_v48 = vld [vmem:[#allocation5 + $0x198] sm:$0xff]  }
  0x5a   :  { %1108 = vmatpush3.bf16.msra.mxu1 %v1260_v15  ;;  %v1291_v45 = vld [vmem:[#allocation5 + $0x190] sm:$0xff]   ;;  %v1295_v49 = vld [vmem:[#allocation5 + $0x160] sm:$0xff]   ;;  %v1298_v52 = vld [vmem:[#allocation5 + $0x168] sm:$0xff]  }
  0x5b   :  { %1109 = vmatprep.subr.bf16.mxu1 %v1263_v18  ;;  %v1296_v50 = vld [vmem:[#allocation5 + $0x120] sm:$0xff]   ;;  %v1299_v53 = vld [vmem:[#allocation5 + $0x128] sm:$0xff]   ;;  %v1301_v55 = vld [vmem:[#allocation5 + $0x170] sm:$0xff]  }
  0x5c   :  { %1088 = vmatpush3.bf16.msra.mxu0 %v1262_v17  ;;  %v1297_v51 = vld [vmem:[#allocation5 + $0x1a0] sm:$0xff]   ;;  %v1300_v54 = vld [vmem:[#allocation5 + $0x1a8] sm:$0xff]   ;;  %v1302_v56 = vld [vmem:[#allocation5 + $0x130] sm:$0xff]  }
  0x5d   :  { %1089 = vmatprep.subr.bf16.mxu0 %v1265_v20  ;;  %v1303_v57 = vld [vmem:[#allocation5 + $0x1b0] sm:$0xff]   ;;  %v1308_v58 = vld [vmem:[#allocation2 + $0x14] ss:$28 sps:$4 sm:$0xff]   ;;  %v1311_v0 = vld [vmem:[#allocation7] sm:$0xff]  }
  0x5e   :  { %1110 = vmatpush3.bf16.msra.mxu1 %v1264_v19  ;;  %v1304_v59 = vld [vmem:[#allocation5 + $0x178] sm:$0xff]   ;;  %v1312_v1 = vld [vmem:[#allocation7 + $0x8] sm:$0xff]   ;;  %v1313_v2 = vld [vmem:[#allocation7 + $0x10] sm:$0xff]  }
  0x5f   :  { %1111 = vmatprep.subr.bf16.mxu1 %v1267_v22  ;;  %v1305_v60 = vld [vmem:[#allocation5 + $0x138] sm:$0xff]   ;;  %v1315_v4 = vld [vmem:[#allocation7 + $0x20] sm:$0xff]   ;;  %v1316_v5 = vld [vmem:[#allocation7 + $0x28] sm:$0xff]  }
  0x60   :  { %1090 = vmatpush3.bf16.msra.mxu0 %v1266_v21  ;;  %v1309_v61 = vld [vmem:[#allocation5 + $0x1b8] sm:$0xff]   ;;  %v1317_v6 = vld [vmem:[#allocation7 + $0x30] sm:$0xff]   ;;  %v1319_v8 = vld [vmem:[#allocation8] sm:$0xff]  }
  0x61   :  { %1091 = vmatprep.subr.bf16.mxu0 %v1269_v24  ;;  %v1306_v62 = vld [vmem:[#allocation2 + $0x10] ss:$28 sps:$4 sm:$0xff]   ;;  %v1310_v63 = vld [vmem:[#allocation2 + $0x18] ss:$28 sps:$4 sm:$0xff]   ;;  %v1320_v9 = vld [vmem:[#allocation8 + $0x8] sm:$0xff]  }
  0x62   :  { %1112 = vmatpush3.bf16.msra.mxu1 %v1268_v23  ;;  %v1314_v3 = vld [vmem:[#allocation7 + $0x18] sm:$0xff]   ;;  %v1321_v10 = vld [vmem:[#allocation8 + $0x10] sm:$0xff]   ;;  %v1323_v12 = vld [vmem:[#allocation8 + $0x20] sm:$0xff]  }
  0x63   :  { %1113 = vmatprep.subr.bf16.mxu1 %v1271_v26  ;;  %v1318_v7 = vld [vmem:[#allocation7 + $0x38] sm:$0xff]   ;;  %v1324_v13 = vld [vmem:[#allocation8 + $0x28] sm:$0xff]  }
  0x64   :  { %1092 = vmatpush3.bf16.msra.mxu0 %v1270_v25  ;;  %v1322_v11 = vld [vmem:[#allocation8 + $0x18] sm:$0xff]   ;;  %v997_v15 = vld [vmem:[%s1615_s2] ss:$0 sm:$0xff] }
  0x65   :  { %1093 = vmatprep.subr.bf16.mxu0 %v1273_v28 }
  0x66   :  { %1114 = vmatpush3.bf16.msra.mxu1 %v1272_v27 }
  0x67   :  { %1115 = vmatprep.subr.bf16.mxu1 %v1275_v30 }
  0x68   :  { %1094 = vmatpush3.bf16.msra.mxu0 %v1274_v29 }
  0x69   :  { %1123 = vmatprep.subr.bf16.mxu0 %v1280_v34 }
  0x6a   :  { %1116 = vmatpush3.bf16.msra.mxu1 %v1279_v33 }
  0x6b   :  { %615 = vmatmul.mubr.bf16.vlgmr.msra.gmra.mrb[0].mxu0 %v1276_v31  ;;  %1172 = vmatprep.subr.bf16.mxu1 %v1453_v38 }
  0x6c   :  { %1124 = vmatpush3.bf16.msra.mxu0 %v1284_v37  ;;  %696 = vmatprep.mubr.bf16.mxu0 %v1308_v58 }
  0x6d   :  { %656 = vmatmul.mubr.bf16.vlgmr.msra.gmra.mrb[0].mxu1 %v1281_v35  ;;  %1125 = vmatprep.subr.bf16.mxu0 %v1286_v40 }
  0x6e   :  { %1173 = vmatpush3.bf16.msra.mxu1 %v1285_v39  ;;  %1188 = vmatprep.mubr.msk.bf16.mxu1 %vm1454_vm0, %v1453_v38 }
  0x6f   :  { %1174 = vmatprep.subr.bf16.mxu1 %v1453_v38 }
  0x70   :  { %1126 = vmatpush3.bf16.msra.mxu0 %v1287_v41 }
  0x71   :  { %1127 = vmatprep.subr.bf16.mxu0 %v1289_v43 }
  0x72   :  { %1175 = vmatpush3.bf16.msra.mxu1 %v1288_v42 }
  0x73   :  { %1176 = vmatprep.subr.bf16.mxu1 %v1453_v38 }
  0x74   :  { %1128 = vmatpush3.bf16.msra.mxu0 %v1290_v44 }
  0x75   :  { %1129 = vmatprep.subr.bf16.mxu0 %v1292_v46 }
  0x76   :  { %1177 = vmatpush3.bf16.msra.mxu1 %v1291_v45 }
  0x77   :  { %1178 = vmatprep.subr.bf16.mxu1 %v1453_v38 }
  0x78   :  { %1130 = vmatpush3.bf16.msra.mxu0 %v1293_v47 }
  0x79   :  { %1131 = vmatprep.subr.bf16.mxu0 %v1295_v49  ;;  %v1325_v49 = vld [vmem:[#allocation8 + $0x30] sm:$0xff]  }
  0x7a   :  { %1179 = vmatpush3.bf16.msra.mxu1 %v1294_v48 }
  0x7b   :  { %1180 = vmatprep.subr.bf16.mxu1 %v1453_v38 }
  0x7c   :  { %1132 = vmatpush3.bf16.msra.mxu0 %v1296_v50  ;;  %v1326_v50 = vld [vmem:[#allocation8 + $0x38] sm:$0xff]  }
  0x7d   :  { %1133 = vmatprep.subr.bf16.mxu0 %v1298_v52 }
  0x7e   :  { %1181 = vmatpush3.bf16.msra.mxu1 %v1297_v51  ;;  %v1061_v51 = vld [vmem:[%s1617_s4] ss:$0 sm:$0xff]  ;;  %s1415_s4 = scalar_lea.vmem %s984_s8, 256 }
  0x7f   :  { %1182 = vmatprep.subr.bf16.mxu1 %v1453_v38  ;;  %p1416_p4 = scmp.ne.s32.totalorder %s984_s8, %s1415_s4  ;;  %p1421_p6 = scmp.lt.s32.totalorder %s1415_s4, %s1415_s4 }
  0x80   :  { %1134 = vmatpush3.bf16.msra.mxu0 %v1299_v53 }
  0x81   :  { %1135 = vmatprep.subr.bf16.mxu0 %v1301_v55  ;;  %p1422_p7 = por %p1421_p6, %p1420_p5 }
  0x82   :  { %1183 = vmatpush3.bf16.msra.mxu1 %v1300_v54 }
  0x83   :  { %1184 = vmatprep.subr.bf16.mxu1 %v1453_v38  ;;  %p1423_p8 = pnand %p1422_p7, %p1416_p4 }
  0x84   :  { %1136 = vmatpush3.bf16.msra.mxu0 %v1302_v56 }
  0x85   :  { %1137 = vmatprep.subr.bf16.mxu0 %v1304_v59 }
  0x86   :  { %1185 = vmatpush3.bf16.msra.mxu1 %v1303_v57 }
  0x87   :  { %1186 = vmatprep.subr.bf16.mxu1 %v1453_v38 }
  0x88   :  { %1138 = vmatpush3.bf16.msra.mxu0 %v1305_v60 }
  0x89   :  { %1192 = vmatprep.subr.bf16.mxu0 %v1453_v38 }
  0x8a   :  { %1187 = vmatpush3.bf16.msra.mxu1 %v1309_v61 }
  0x8b   :  { %1212 = vmatprep.subr.bf16.mxu1 %v1453_v38  ;;  %697 = vmatmul.mubr.bf16.vlgmr.msra.gmra.mrb[4].mxu0 %v1306_v62 }
  0x8c   :  { %1208 = vmatprep.mubr.msk.bf16.mxu0 %vm1454_vm0, %v1453_v38  ;;  %1193 = vmatpush3.bf16.msra.mxu0 %v1311_v0 }
  0x8d   :  { %1189 = vmatmul.mubr.bf16.vlgmr.msra.gmra.mrb[4].mxu1 %v1310_v63  ;;  %1194 = vmatprep.subr.bf16.mxu0 %v1453_v38 }
  0x8e   :  { %1228 = vmatprep.mubr.msk.bf16.mxu1 %vm1454_vm0, %v1453_v38  ;;  %1213 = vmatpush3.bf16.msra.mxu1 %v1319_v8 }
  0x8f   :  { %1214 = vmatprep.subr.bf16.mxu1 %v1453_v38 }
  0x90   :  { %1195 = vmatpush3.bf16.msra.mxu0 %v1312_v1 }
  0x91   :  { %1196 = vmatprep.subr.bf16.mxu0 %v1453_v38 }
  0x92   :  { %1215 = vmatpush3.bf16.msra.mxu1 %v1320_v9 }
  0x93   :  { %1216 = vmatprep.subr.bf16.mxu1 %v1453_v38 }
  0x94   :  { %1197 = vmatpush3.bf16.msra.mxu0 %v1313_v2 }
  0x95   :  { %1198 = vmatprep.subr.bf16.mxu0 %v1453_v38 }
  0x96   :  { %1217 = vmatpush3.bf16.msra.mxu1 %v1321_v10 }
  0x97   :  { %1218 = vmatprep.subr.bf16.mxu1 %v1453_v38 }
  0x98   :  { %1199 = vmatpush3.bf16.msra.mxu0 %v1314_v3 }
  0x99   :  { %1200 = vmatprep.subr.bf16.mxu0 %v1453_v38 }
  0x9a   :  { %1219 = vmatpush3.bf16.msra.mxu1 %v1322_v11 }
  0x9b   :  { %1220 = vmatprep.subr.bf16.mxu1 %v1453_v38 }
  0x9c   :  { %1201 = vmatpush3.bf16.msra.mxu0 %v1315_v4 }
  0x9d   :  { %1202 = vmatprep.subr.bf16.mxu0 %v1453_v38 }
  0x9e   :  { %1221 = vmatpush3.bf16.msra.mxu1 %v1323_v12 }
  0x9f   :  { %1222 = vmatprep.subr.bf16.mxu1 %v1453_v38 }
  0xa0   :  { %1203 = vmatpush3.bf16.msra.mxu0 %v1316_v5 }
  0xa1   :  { %1204 = vmatprep.subr.bf16.mxu0 %v1453_v38 }
  0xa2   :  { %1223 = vmatpush3.bf16.msra.mxu1 %v1324_v13 }
  0xa3   :  { %1224 = vmatprep.subr.bf16.mxu1 %v1453_v38 }
  0xa4   :  { %1205 = vmatpush3.bf16.msra.mxu0 %v1317_v6 }
  0xa5   :  { %1206 = vmatprep.subr.bf16.mxu0 %v1453_v38 }
  0xa6   :  { %1225 = vmatpush3.bf16.msra.mxu1 %v1325_v49 }
  0xa7   :  { %1226 = vmatprep.subr.bf16.mxu1 %v1453_v38  ;;  %v1070_v38 = vld [vmem:[%s1619_s6] ss:$0 sm:$0xff] }
  0xa8   :  { %1207 = vmatpush3.bf16.msra.mxu0 %v1318_v7 }
  0xaa   :  { %1227 = vmatpush3.bf16.msra.mxu1 %v1326_v50 }
 0x13e   :  { %v1095_v14 = vpop.f32.mrb[0].mxu0 }
 0x13f   :  { %v1096_v16 = vpop.f32.mrb[1].mxu0 }
 0x140   :  { %v1097_v17 = vadd.f32 %v1096_v16, %v1095_v14  ;;  %v1098_v18 = vpop.f32.mrb[2].mxu0  ;;  %v1117_v19 = vpop.f32.mrb[0].mxu1 }
 0x141   :  { %v1099_v20 = vpop.f32.mrb[3].mxu0  ;;  %v1118_v23 = vpop.f32.mrb[1].mxu1 }
 0x142   :  { %v617_v21 = vadd.f32 %v1097_v17, %v997_v15  ;;  %v1100_v22 = vadd.f32 %v1099_v20, %v1098_v18  ;;  %v1119_v24 = vadd.f32 %v1118_v23, %v1117_v19  ;;  %v1120_v25 = vpop.f32.mrb[2].mxu1 }
 0x143   :  { %v1121_v27 = vpop.f32.mrb[3].mxu1 }
 0x144   :  { %v620_v26 = vadd.f32 %v1100_v22, %v997_v15  ;;  %v658_v28 = vadd.f32 %v1119_v24, %v617_v21  ;;  %v1122_v29 = vadd.f32 %v1121_v27, %v1120_v25 }
 0x146   :  { %v661_v30 = vadd.f32 %v1122_v29, %v620_v26 }
 0x15e   :  { %v1139_v31 = vpop.f32.mrb[4].mxu0 }
 0x15f   :  { %v1140_v32 = vpop.f32.mrb[5].mxu0 }
 0x160   :  { %v739_v33 = vpop.f32.mrb[4].mxu1  ;;  %v1141_v34 = vadd.f32 %v1140_v32, %v1139_v31  ;;  %v1142_v35 = vpop.f32.mrb[6].mxu0 }
 0x161   :  { %v1190_v36 = vpop.f32.mrb[5].mxu1  ;;  %v1143_v37 = vpop.f32.mrb[7].mxu0 }
 0x162   :  { %v742_v39 = vpop.f32.mrb[6].mxu1  ;;  %v699_v40 = vadd.f32 %v1141_v34, %v658_v28  ;;  %v1144_v41 = vadd.f32 %v1143_v37, %v1142_v35 }
 0x163   :  { %v1191_v42 = vpop.f32.mrb[7].mxu1 }
 0x164   :  { %v740_v43 = vadd.f32 %v739_v33, %v699_v40  ;;  %v702_v44 = vadd.f32 %v1144_v41, %v661_v30 }
 0x166   :  { %v743_v45 = vadd.f32 %v742_v39, %v702_v44  ;;  %v746_v46 = vmax.f32 %v740_v43, 0.0 }
 0x168   :  { %v747_v47 = vmax.f32 %v743_v45, 0.0 }
 0x16a   :  { %v748_v48 = vpack.c.bf16 %v747_v47, %v746_v46 }
 0x16c   :  { %1209 = vmatmul.mubr.bf16.vlgmr.msra.gmra.mrb[8].mxu0 %v748_v48 }
 0x23f   :  { %v854_v52 = vpop.f32.mrb[8].mxu0 }
 0x240   :  { %v855_v53 = vadd.f32 %v1061_v51, %v854_v52  ;;  %v1210_v54 = vpop.f32.mrb[9].mxu0 }
 0x241   :  { %v857_v55 = vpop.f32.mrb[10].mxu0 }
 0x242   :  { %v858_v56 = vadd.f32 %v1061_v51, %v857_v55  ;;  %v1211_v57 = vpop.f32.mrb[11].mxu0  ;;  %v861_v58 = vmax.f32 %v855_v53, 0.0 }
 0x244   :  { %v862_v59 = vmax.f32 %v858_v56, 0.0 }
 0x246   :  { %v863_v60 = vpack.c.bf16 %v862_v59, %v861_v58 }
 0x248   :  { %1229 = vmatmul.mubr.bf16.vlgmr.msra.gmra.mrb[8].mxu1 %v863_v60 }
 0x31b   :  { %v969_v61 = vpop.f32.mrb[8].mxu1 }
 0x31c   :  { %v970_v62 = vadd.f32 %v1070_v38, %v969_v61  ;;  %v1230_v63 = vpop.f32.mrb[9].mxu1 }
 0x31d   :  { %v972_v0 = vpop.f32.mrb[10].mxu1 }
 0x31e   :  { %976 = vst [vmem:[#allocation10] sm:$0xff] %v970_v62  ;;  %v973_v1 = vadd.f32 %v1070_v38, %v972_v0  ;;  %v1231_v2 = vpop.f32.mrb[11].mxu1 }
 0x320   :  { %977 = vst [vmem:[#allocation10 + $0x8] sm:$0xff] %v973_v1 }
 0x321   :  { %1426 = shalt.err (!%p1423_p8)
}
 0x322   :  { %s1427_s10 = scalar_lea.hbm %s1620_s7, 256 }
 0x323   :  { %p1428_p9 = scmp.ne.s32.totalorder %s1620_s7, %s1427_s10  ;;  %p1431_p10 = scmp.lt.u32.totalorder %s1427_s10, %s1620_s7 }
 0x325   :  { %p1433_p11 = pnand %p1431_p10, %p1428_p9 }
 0x327   :  { %1436 = shalt.err (!%p1433_p11)
}
 0x328   :  { %s1456_s18 = smov 128   ;;  %s1457_s0 = smov 8  }
 0x329   :  { %989 = dma.vmem_to_hbm [thread:$0]  %s984_s8, 256, %s1620_s7, [#allocation4], %s1456_s18, %s1456_s18, %s1457_s0  }
 0x32a   :  { %1443 = dma.done.wait [#allocation4], 256  }
 0x32b   :  { %1444 = vsyncadd [#allocation4], 4294967040 }
 0x32c   :  { %993 = vsyncpa [#allocation3], 1 }
 0x32d   :  { %994 = vsyncpa [#allocation6], 1 }
 0x32e   :  { %995 = vsyncpa [#allocation9], 1 }
 0x32f   :  { %996 = vsyncpa [#allocation4], 1 }

</bundles_post_ra>
